<compile_context>
chip_gen: v5e
topology: v5e:2x2
jax: 0.10.0
libtpu: 0.0.40
codegen_flags: <defaults>
</compile_context>

<pallas_src>
import functools
import math

import jax
import jax.numpy as jnp
from jax.experimental import pallas as pl
from jax.experimental.pallas import tpu as pltpu


# Staging-buffer layout: prev activations live at lanes [0, HSLOT), the current
# hidden state at lanes [HSLOT, KPAD).  Both offsets are lane-tile (128)
# aligned, so every store into the staging buffer is a supported aligned store.
HSLOT = 128
KPAD = 256

_VMEM = pl.BlockSpec(memory_space=pltpu.MemorySpace.VMEM)


# ---------------------------------------------------------------------------
# Fused kernel: all layers + output projection in one invocation
# ---------------------------------------------------------------------------
def _make_kernel(n_layers, B, H, Din):
    L = n_layers

    def kernel(*refs):
        # inputs: x, h[0..L-1], (w_pad, b)[0..L-1], wout_t, bout
        # outputs: h_new[0..L-1], out
        # scratch: cat staging buffer (B, KPAD)
        x_ref = refs[0]
        h_in_refs = refs[1:1 + L]
        p = 1 + L
        w_refs = [refs[p + 2 * i] for i in range(L)]
        b_refs = [refs[p + 2 * i + 1] for i in range(L)]
        p += 2 * L
        wout_ref = refs[p]
        bout_ref = refs[p + 1]
        p += 2
        h_out_refs = refs[p:p + L]
        out_ref = refs[p + L]
        cat_ref = refs[p + L + 1]

        # Zero the staging buffer once so padding lanes contribute exactly 0
        # (padded weight rows are also zero; zeroing guards against NaN/Inf
        # garbage in uninitialized VMEM).
        cat_ref[...] = jnp.zeros((B, KPAD), jnp.float32)

        prev = x_ref[...]          # (B, Din) for layer 0
        prev_w = Din
        for i in range(L):
            # Stage cat((prev, h_i), dim=1) into lane-aligned slots.
            cat_ref[:, 0:prev_w] = prev
            cat_ref[:, HSLOT:HSLOT + H] = h_in_refs[i][...]
            # Single MXU matmul per cell: (B, KPAD) @ (KPAD, H).
            acc = jnp.dot(cat_ref[...], w_refs[i][...],
                          preferred_element_type=jnp.float32)
            h_new = jnp.tanh(acc + b_refs[i][...])
            h_out_refs[i][...] = h_new      # aliased to the incoming h_i buffer
            prev = h_new                    # next layer uses the UPDATED h_i
            prev_w = H

        # Final projection (no activation).
        out_ref[...] = (jnp.dot(prev, wout_ref[...],
                                preferred_element_type=jnp.float32)
                        + bout_ref[...])

    return kernel


@functools.lru_cache(maxsize=None)
def _build_fused_call(n_layers, B, H, Din):
    L = n_layers
    n_inputs = 1 + L + 2 * L + 2
    out_shape = tuple([jax.ShapeDtypeStruct((B, H), jnp.float32)] * L
                      + [jax.ShapeDtypeStruct((B, Din), jnp.float32)])
    return pl.pallas_call(
        _make_kernel(L, B, H, Din),
        out_shape=out_shape,
        in_specs=[_VMEM] * n_inputs,
        out_specs=tuple([_VMEM] * (L + 1)),
        scratch_shapes=[pltpu.VMEM((B, KPAD), jnp.float32)],
        # In-place hidden update: incoming hidden states alias their outputs.
        input_output_aliases={1 + i: i for i in range(L)},
    )


# ---------------------------------------------------------------------------
# Parameter init (mirrors the PyTorch __init__) + one-time kernel-layout prep
# ---------------------------------------------------------------------------
def init_params(key, n_hidden, n_layers, input_dim):
    params = {"hidden": [], "out": {}}
    for i in range(n_layers):
        n_in = (input_dim + n_hidden) if i == 0 else (n_hidden * 2)
        key, kw, kb = jax.random.split(key, 3)
        # kaiming_uniform_(nonlinearity='relu'): bound = sqrt(6 / fan_in)
        bound_w = math.sqrt(6.0 / n_in)
        w = jax.random.uniform(kw, (n_hidden, n_in), jnp.float32, -bound_w, bound_w)
        # torch Linear default bias init: U(-1/sqrt(fan_in), 1/sqrt(fan_in))
        bound_b = 1.0 / math.sqrt(n_in)
        b = jax.random.uniform(kb, (n_hidden,), jnp.float32, -bound_b, bound_b)
        params["hidden"].append({"w": w, "b": b})
    key, kw, kb = jax.random.split(key, 3)
    # xavier_uniform_: bound = sqrt(6 / (fan_in + fan_out))
    bound_w = math.sqrt(6.0 / (n_hidden + input_dim))
    params["out"]["w"] = jax.random.uniform(
        kw, (input_dim, n_hidden), jnp.float32, -bound_w, bound_w
    )
    bound_b = 1.0 / math.sqrt(n_hidden)
    params["out"]["b"] = jax.random.uniform(
        kb, (input_dim,), jnp.float32, -bound_b, bound_b
    )
    return params


def prep_params(params, input_dim, n_hidden):
    """One-time transform to kernel layout: transpose + zero-pad weights so
    each cell is a single (B, KPAD) @ (KPAD, H) matmul.  Done once at init,
    never per forward."""
    # TODO(synk): for input_dim or n_hidden > 128, widen the staging slots (and
    # add a K-blocked accumulator to respect v7x's 64 MiB VMEM).
    assert input_dim <= HSLOT and n_hidden <= HSLOT
    H = n_hidden
    prepped = {"hidden": [], "out": {}}
    for i, layer in enumerate(params["hidden"]):
        dprev = input_dim if i == 0 else H
        w_t = jnp.transpose(layer["w"])                     # (dprev + H, H)
        w_pad = jnp.zeros((KPAD, H), jnp.float32)
        w_pad = w_pad.at[0:dprev, :].set(w_t[0:dprev, :])   # prev part
        w_pad = w_pad.at[HSLOT:HSLOT + H, :].set(w_t[dprev:, :])  # hidden part
        prepped["hidden"].append({"w": w_pad, "b": layer["b"].reshape(1, H)})
    prepped["out"]["w"] = jnp.transpose(params["out"]["w"])  # (H, input_dim)
    prepped["out"]["b"] = params["out"]["b"].reshape(1, -1)
    return prepped


# ---------------------------------------------------------------------------
# Forward pass (matches RNN.forward semantics, including in-place hidden update)
# ---------------------------------------------------------------------------
@jax.jit
def rnn_forward(prepped, X, hidden_layer):
    L = len(hidden_layer)
    B, Din = X.shape
    H = hidden_layer[0].shape[1]
    fused = _build_fused_call(L, B, H, Din)

    args = [X, *hidden_layer]
    for lyr in prepped["hidden"]:
        args += [lyr["w"], lyr["b"]]
    args += [prepped["out"]["w"], prepped["out"]["b"]]

    results = fused(*args)
    new_hidden = list(results[:L])
    output = results[L]
    return output, new_hidden


# pure-JAX reference for the correctness check
def rnn_forward_ref(params, X, hidden_layer):
    n_layers = len(hidden_layer)
    hs = list(hidden_layer)
    for i in range(n_layers):
        prev = X if i == 0 else hs[i - 1]
        combined = jnp.concatenate([prev, hs[i]], axis=1)
        hs[i] = jnp.tanh(combined @ params["hidden"][i]["w"].T + params["hidden"][i]["b"])
    output = hs[-1] @ params["out"]["w"].T + params["out"]["b"]
    return output, hs


if __name__ == "__main__":
    B, input_dim, n_hidden, n_layers = 8, 16, 32, 3

    key = jax.random.PRNGKey(0)
    key, kx, kh = jax.random.split(key, 3)
    params = init_params(key, n_hidden, n_layers, input_dim)
    prepped = prep_params(params, input_dim, n_hidden)   # one-time layout prep

    X = jax.random.normal(kx, (B, input_dim), jnp.float32)
    hidden_layer = [
        jax.random.normal(jax.random.fold_in(kh, i), (B, n_hidden), jnp.float32)
        for i in range(n_layers)
    ]

    out, new_hidden = rnn_forward(prepped, X, hidden_layer)
    out = jax.block_until_ready(out)
    new_hidden = [jax.block_until_ready(h) for h in new_hidden]

    # sanity check against pure-JAX reference
    out_ref, hid_ref = rnn_forward_ref(params, X, hidden_layer)
    assert out.shape == (B, input_dim)
    assert all(h.shape == (B, n_hidden) for h in new_hidden)
    assert jnp.allclose(out, out_ref, atol=1e-5, rtol=1e-5)
    for h, hr in zip(new_hidden, hid_ref):
        assert jnp.allclose(h, hr, atol=1e-5, rtol=1e-5)

    print("KERNEL_OK")
</pallas_src>

<mosaic_0001>
module attributes {stable_mosaic.version = 11 : i64} {
  func.func @kernel(%arg0: memref<8x16xf32, #tpu.memory_space<vmem>>, %arg1: memref<8x32xf32, #tpu.memory_space<vmem>>, %arg2: memref<8x32xf32, #tpu.memory_space<vmem>>, %arg3: memref<8x32xf32, #tpu.memory_space<vmem>>, %arg4: memref<256x32xf32, #tpu.memory_space<vmem>>, %arg5: memref<1x32xf32, #tpu.memory_space<vmem>>, %arg6: memref<256x32xf32, #tpu.memory_space<vmem>>, %arg7: memref<1x32xf32, #tpu.memory_space<vmem>>, %arg8: memref<256x32xf32, #tpu.memory_space<vmem>>, %arg9: memref<1x32xf32, #tpu.memory_space<vmem>>, %arg10: memref<32x16xf32, #tpu.memory_space<vmem>>, %arg11: memref<1x16xf32, #tpu.memory_space<vmem>>, %arg12: memref<8x32xf32, #tpu.memory_space<vmem>>, %arg13: memref<8x32xf32, #tpu.memory_space<vmem>>, %arg14: memref<8x32xf32, #tpu.memory_space<vmem>>, %arg15: memref<8x16xf32, #tpu.memory_space<vmem>>, %arg16: memref<8x256xf32, #tpu.memory_space<vmem>>) attributes {dimension_semantics = [], scalar_prefetch = 0 : i64, scratch_operands = 1 : i64, tpu.core_type = #tpu.core_type<tc>} {
    %cst = arith.constant 0.000000e+00 : f32
    %0 = vector.broadcast %cst : f32 to vector<8x256xf32>
    %c0 = arith.constant 0 : index
    %c0_0 = arith.constant 0 : index
    %1 = vector.load %arg16[%c0, %c0_0] : memref<8x256xf32, #tpu.memory_space<vmem>>, vector<8x256xf32>
    tpu.vector_store %arg16[%c0, %c0_0], %0 {strides = array<i32>} : memref<8x256xf32, #tpu.memory_space<vmem>>, vector<8x256xf32>,
    %c0_1 = arith.constant 0 : index
    %c0_2 = arith.constant 0 : index
    %2 = vector.load %arg0[%c0_1, %c0_2] : memref<8x16xf32, #tpu.memory_space<vmem>>, vector<8x16xf32>
    %c0_3 = arith.constant 0 : index
    %c0_4 = arith.constant 0 : index
    %3 = vector.load %arg16[%c0_3, %c0_4] : memref<8x256xf32, #tpu.memory_space<vmem>>, vector<8x16xf32>
    tpu.vector_store %arg16[%c0_3, %c0_4], %2 {strides = array<i32>} : memref<8x256xf32, #tpu.memory_space<vmem>>, vector<8x16xf32>,
    %c0_5 = arith.constant 0 : index
    %c0_6 = arith.constant 0 : index
    %4 = vector.load %arg1[%c0_5, %c0_6] : memref<8x32xf32, #tpu.memory_space<vmem>>, vector<8x32xf32>
    %c0_7 = arith.constant 0 : index
    %c128 = arith.constant 128 : index
    %5 = vector.load %arg16[%c0_7, %c128] : memref<8x256xf32, #tpu.memory_space<vmem>>, vector<8x32xf32>
    tpu.vector_store %arg16[%c0_7, %c128], %4 {strides = array<i32>} : memref<8x256xf32, #tpu.memory_space<vmem>>, vector<8x32xf32>,
    %c0_8 = arith.constant 0 : index
    %c0_9 = arith.constant 0 : index
    %6 = vector.load %arg16[%c0_8, %c0_9] : memref<8x256xf32, #tpu.memory_space<vmem>>, vector<8x256xf32>
    %c0_10 = arith.constant 0 : index
    %c0_11 = arith.constant 0 : index
    %7 = vector.load %arg4[%c0_10, %c0_11] : memref<256x32xf32, #tpu.memory_space<vmem>>, vector<256x32xf32>
    %cst_12 = arith.constant dense<0.000000e+00> : vector<8x32xf32>
    %8 = tpu.matmul %6, %7, %cst_12 {dimension_numbers = #tpu.dot_dimension_numbers<[1], [0], [0], [1], [0, 0, 1, 1], [], []>} : vector<8x256xf32>, vector<256x32xf32>, vector<8x32xf32> -> vector<8x32xf32>
    %c0_13 = arith.constant 0 : index
    %c0_14 = arith.constant 0 : index
    %9 = vector.load %arg5[%c0_13, %c0_14] : memref<1x32xf32, #tpu.memory_space<vmem>>, vector<1x32xf32>
    %10 = vector.broadcast %9 : vector<1x32xf32> to vector<8x32xf32>
    %11 = arith.addf %8, %10 : vector<8x32xf32>
    %12 = math.tanh %11 : vector<8x32xf32>
    %c0_15 = arith.constant 0 : index
    %c0_16 = arith.constant 0 : index
    %13 = vector.load %arg12[%c0_15, %c0_16] : memref<8x32xf32, #tpu.memory_space<vmem>>, vector<8x32xf32>
    tpu.vector_store %arg12[%c0_15, %c0_16], %12 {strides = array<i32>} : memref<8x32xf32, #tpu.memory_space<vmem>>, vector<8x32xf32>,
    %c0_17 = arith.constant 0 : index
    %c0_18 = arith.constant 0 : index
    %14 = vector.load %arg16[%c0_17, %c0_18] : memref<8x256xf32, #tpu.memory_space<vmem>>, vector<8x32xf32>
    tpu.vector_store %arg16[%c0_17, %c0_18], %12 {strides = array<i32>} : memref<8x256xf32, #tpu.memory_space<vmem>>, vector<8x32xf32>,
    %c0_19 = arith.constant 0 : index
    %c0_20 = arith.constant 0 : index
    %15 = vector.load %arg2[%c0_19, %c0_20] : memref<8x32xf32, #tpu.memory_space<vmem>>, vector<8x32xf32>
    %c0_21 = arith.constant 0 : index
    %c128_22 = arith.constant 128 : index
    %16 = vector.load %arg16[%c0_21, %c128_22] : memref<8x256xf32, #tpu.memory_space<vmem>>, vector<8x32xf32>
    tpu.vector_store %arg16[%c0_21, %c128_22], %15 {strides = array<i32>} : memref<8x256xf32, #tpu.memory_space<vmem>>, vector<8x32xf32>,
    %c0_23 = arith.constant 0 : index
    %c0_24 = arith.constant 0 : index
    %17 = vector.load %arg16[%c0_23, %c0_24] : memref<8x256xf32, #tpu.memory_space<vmem>>, vector<8x256xf32>
    %c0_25 = arith.constant 0 : index
    %c0_26 = arith.constant 0 : index
    %18 = vector.load %arg6[%c0_25, %c0_26] : memref<256x32xf32, #tpu.memory_space<vmem>>, vector<256x32xf32>
    %cst_27 = arith.constant dense<0.000000e+00> : vector<8x32xf32>
    %19 = tpu.matmul %17, %18, %cst_27 {dimension_numbers = #tpu.dot_dimension_numbers<[1], [0], [0], [1], [0, 0, 1, 1], [], []>} : vector<8x256xf32>, vector<256x32xf32>, vector<8x32xf32> -> vector<8x32xf32>
    %c0_28 = arith.constant 0 : index
    %c0_29 = arith.constant 0 : index
    %20 = vector.load %arg7[%c0_28, %c0_29] : memref<1x32xf32, #tpu.memory_space<vmem>>, vector<1x32xf32>
    %21 = vector.broadcast %20 : vector<1x32xf32> to vector<8x32xf32>
    %22 = arith.addf %19, %21 : vector<8x32xf32>
    %23 = math.tanh %22 : vector<8x32xf32>
    %c0_30 = arith.constant 0 : index
    %c0_31 = arith.constant 0 : index
    %24 = vector.load %arg13[%c0_30, %c0_31] : memref<8x32xf32, #tpu.memory_space<vmem>>, vector<8x32xf32>
    tpu.vector_store %arg13[%c0_30, %c0_31], %23 {strides = array<i32>} : memref<8x32xf32, #tpu.memory_space<vmem>>, vector<8x32xf32>,
    %c0_32 = arith.constant 0 : index
    %c0_33 = arith.constant 0 : index
    %25 = vector.load %arg16[%c0_32, %c0_33] : memref<8x256xf32, #tpu.memory_space<vmem>>, vector<8x32xf32>
    tpu.vector_store %arg16[%c0_32, %c0_33], %23 {strides = array<i32>} : memref<8x256xf32, #tpu.memory_space<vmem>>, vector<8x32xf32>,
    %c0_34 = arith.constant 0 : index
    %c0_35 = arith.constant 0 : index
    %26 = vector.load %arg3[%c0_34, %c0_35] : memref<8x32xf32, #tpu.memory_space<vmem>>, vector<8x32xf32>
    %c0_36 = arith.constant 0 : index
    %c128_37 = arith.constant 128 : index
    %27 = vector.load %arg16[%c0_36, %c128_37] : memref<8x256xf32, #tpu.memory_space<vmem>>, vector<8x32xf32>
    tpu.vector_store %arg16[%c0_36, %c128_37], %26 {strides = array<i32>} : memref<8x256xf32, #tpu.memory_space<vmem>>, vector<8x32xf32>,
    %c0_38 = arith.constant 0 : index
    %c0_39 = arith.constant 0 : index
    %28 = vector.load %arg16[%c0_38, %c0_39] : memref<8x256xf32, #tpu.memory_space<vmem>>, vector<8x256xf32>
    %c0_40 = arith.constant 0 : index
    %c0_41 = arith.constant 0 : index
    %29 = vector.load %arg8[%c0_40, %c0_41] : memref<256x32xf32, #tpu.memory_space<vmem>>, vector<256x32xf32>
    %cst_42 = arith.constant dense<0.000000e+00> : vector<8x32xf32>
    %30 = tpu.matmul %28, %29, %cst_42 {dimension_numbers = #tpu.dot_dimension_numbers<[1], [0], [0], [1], [0, 0, 1, 1], [], []>} : vector<8x256xf32>, vector<256x32xf32>, vector<8x32xf32> -> vector<8x32xf32>
    %c0_43 = arith.constant 0 : index
    %c0_44 = arith.constant 0 : index
    %31 = vector.load %arg9[%c0_43, %c0_44] : memref<1x32xf32, #tpu.memory_space<vmem>>, vector<1x32xf32>
    %32 = vector.broadcast %31 : vector<1x32xf32> to vector<8x32xf32>
    %33 = arith.addf %30, %32 : vector<8x32xf32>
    %34 = math.tanh %33 : vector<8x32xf32>
    %c0_45 = arith.constant 0 : index
    %c0_46 = arith.constant 0 : index
    %35 = vector.load %arg14[%c0_45, %c0_46] : memref<8x32xf32, #tpu.memory_space<vmem>>, vector<8x32xf32>
    tpu.vector_store %arg14[%c0_45, %c0_46], %34 {strides = array<i32>} : memref<8x32xf32, #tpu.memory_space<vmem>>, vector<8x32xf32>,
    %c0_47 = arith.constant 0 : index
    %c0_48 = arith.constant 0 : index
    %36 = vector.load %arg10[%c0_47, %c0_48] : memref<32x16xf32, #tpu.memory_space<vmem>>, vector<32x16xf32>
    %cst_49 = arith.constant dense<0.000000e+00> : vector<8x16xf32>
    %37 = tpu.matmul %34, %36, %cst_49 {dimension_numbers = #tpu.dot_dimension_numbers<[1], [0], [0], [1], [0, 0, 1, 1], [], []>} : vector<8x32xf32>, vector<32x16xf32>, vector<8x16xf32> -> vector<8x16xf32>
    %c0_50 = arith.constant 0 : index
    %c0_51 = arith.constant 0 : index
    %38 = vector.load %arg11[%c0_50, %c0_51] : memref<1x16xf32, #tpu.memory_space<vmem>>, vector<1x16xf32>
    %39 = vector.broadcast %38 : vector<1x16xf32> to vector<8x16xf32>
    %40 = arith.addf %37, %39 : vector<8x16xf32>
    %c0_52 = arith.constant 0 : index
    %c0_53 = arith.constant 0 : index
    %41 = vector.load %arg15[%c0_52, %c0_53] : memref<8x16xf32, #tpu.memory_space<vmem>>, vector<8x16xf32>
    tpu.vector_store %arg15[%c0_52, %c0_53], %40 {strides = array<i32>} : memref<8x16xf32, #tpu.memory_space<vmem>>, vector<8x16xf32>,
    return
  }
}

</mosaic_0001>

<bundles_post_ra>
// kernel: rnn_forward.1
= control target key start
LH: loop header
LB: loop body
LE: loop exit
PB: predicated region body
PF: predicated region fallthrough
CT: control target
= control target key end

     0   :  { %v399_v4 = vmov 0.0   ;;  %vm49_vm0 = vcmask 130048   ;;  %vm52_vm1 = vcmask 261120   ;;  %s828_s0 = inlined_call_operand.vmem [shape: f32[8,16], index: 0, kind: input, shape index: {}]   ;;  %s829_s1 = inlined_call_operand.vmem [shape: f32[8,32], index: 1, kind: input, shape index: {}, may-alias: {1,12}]   ;;  %s830_s2 = inlined_call_operand.vmem [shape: f32[8,32], index: 2, kind: input, shape index: {}, may-alias: {2,13}]   ;;  %s831_s3 = inlined_call_operand.vmem [shape: f32[8,32], index: 3, kind: input, shape index: {}, may-alias: {3,14}]   ;;  %s832_s4 = inlined_call_operand.vmem [shape: f32[256,32], index: 4, kind: input, shape index: {}]   ;;  %s833_s5 = inlined_call_operand.vmem [shape: f32[1,32], index: 5, kind: input, shape index: {}]   ;;  %s834_s6 = inlined_call_operand.vmem [shape: f32[256,32], index: 6, kind: input, shape index: {}]   ;;  %s835_s7 = inlined_call_operand.vmem [shape: f32[1,32], index: 7, kind: input, shape index: {}]   ;;  %s836_s8 = inlined_call_operand.vmem [shape: f32[256,32], index: 8, kind: input, shape index: {}]   ;;  %s837_s9 = inlined_call_operand.vmem [shape: f32[1,32], index: 9, kind: input, shape index: {}]   ;;  %s838_s10 = inlined_call_operand.vmem [shape: f32[32,16], index: 10, kind: input, shape index: {}]   ;;  %s839_s11 = inlined_call_operand.vmem [shape: f32[1,16], index: 11, kind: input, shape index: {}]   ;;  %s840_s12 = inlined_call_operand.vmem [shape: f32[8,32], index: 12, kind: output, shape index: {0}, may-alias: {1,12}]   ;;  %s841_s13 = inlined_call_operand.vmem [shape: f32[8,32], index: 13, kind: output, shape index: {1}, may-alias: {2,13}]   ;;  %s842_s14 = inlined_call_operand.vmem [shape: f32[8,32], index: 14, kind: output, shape index: {2}, may-alias: {3,14}]   ;;  %s843_s15 = inlined_call_operand.hbm [shape: f32[8,16], index: 15, kind: output, shape index: {3}]  }
   0x1   :  { %v71_v0 = vld [vmem:[%s832_s4 + $0x78] sm:$0xff]  ;;  %v70_v1 = vld [vmem:[%s832_s4 + $0x70] sm:$0xff]  ;;  %46 = vst [vmem:[#allocation2] sm:$0xff] %v399_v4  ;;  %v69_v5 = vld [vmem:[%s832_s4 + $0x68] sm:$0xff] }
   0x2   :  { %v87_v2 = vld [vmem:[%s832_s4 + $0xf8] sm:$0xff]  ;;  %92 = vmatpush.msra.mxu0 %v71_v0  ;;  %v86_v3 = vld [vmem:[%s832_s4 + $0xf0] sm:$0xff]  ;;  %v85_v6 = vld [vmem:[%s832_s4 + $0xe8] sm:$0xff]  ;;  %47 = vst [vmem:[#allocation2 + $0x8] sm:$0xff] %v399_v4 }
   0x3   :  { %112 = vmatpush.msra.mxu1 %v87_v2  ;;  %v68_v7 = vld [vmem:[%s832_s4 + $0x60] sm:$0xff]  ;;  %v67_v9 = vld [vmem:[%s832_s4 + $0x58] sm:$0xff]  ;;  %v66_v11 = vld [vmem:[%s832_s4 + $0x50] sm:$0xff] }
   0x4   :  { %93 = vmatpush.msra.mxu0 %v70_v1  ;;  %v84_v8 = vld [vmem:[%s832_s4 + $0xe0] sm:$0xff]  ;;  %v83_v10 = vld [vmem:[%s832_s4 + $0xd8] sm:$0xff]  ;;  %v82_v12 = vld [vmem:[%s832_s4 + $0xd0] sm:$0xff] }
   0x5   :  { %113 = vmatpush.msra.mxu1 %v86_v3  ;;  %v65_v13 = vld [vmem:[%s832_s4 + $0x48] sm:$0xff]  ;;  %v48_v15 = vld [vmem:[%s828_s0] sm:$0xff]  ;;  %v154_v18 = vld [vmem:[%s834_s6 + $0x78] sm:$0xff] }
   0x6   :  { %94 = vmatpush.msra.mxu0 %v69_v5  ;;  %v81_v14 = vld [vmem:[%s832_s4 + $0xc8] sm:$0xff]  ;;  %v64_v16 = vld [vmem:[%s832_s4 + $0x40] sm:$0xff]  ;;  %50 = vst.msk [vmem:[#allocation2] sm:$0xff] %vm49_vm0, %v48_v15  ;;  %175 = vmatpush.msra.mxu2 %v154_v18  ;;  %v153_v20 = vld [vmem:[%s834_s6 + $0x70] sm:$0xff] }
   0x7   :  { %114 = vmatpush.msra.mxu1 %v85_v6  ;;  %v51_v17 = vld [vmem:[%s829_s1] sm:$0xff]  ;;  %v170_v21 = vld [vmem:[%s834_s6 + $0xf8] sm:$0xff]  ;;  %v152_v23 = vld [vmem:[%s834_s6 + $0x68] sm:$0xff] }
   0x8   :  { %95 = vmatpush.msra.mxu0 %v68_v7  ;;  %v80_v19 = vld [vmem:[%s832_s4 + $0xc0] sm:$0xff]  ;;  %53 = vst.msk [vmem:[#allocation2 + $0x8] sm:$0xff] %vm52_vm1, %v51_v17  ;;  %v63_v22 = vld [vmem:[%s832_s4 + $0x38] sm:$0xff]  ;;  %v169_v24 = vld [vmem:[%s834_s6 + $0xf0] sm:$0xff]  ;;  %176 = vmatpush.msra.mxu2 %v153_v20 }
   0x9   :  { %115 = vmatpush.msra.mxu1 %v84_v8  ;;  %v62_v25 = vld [vmem:[%s832_s4 + $0x30] sm:$0xff]  ;;  %v79_v26 = vld [vmem:[%s832_s4 + $0xb8] sm:$0xff]  ;;  %195 = vmatpush.msra.mxu3 %v170_v21  ;;  %v135_v28 = vld [vmem:[%s830_s2] sm:$0xff] }
   0xa   :  { %96 = vmatpush.msra.mxu0 %v67_v9  ;;  %v78_v27 = vld [vmem:[%s832_s4 + $0xb0] sm:$0xff]  ;;  %v151_v29 = vld [vmem:[%s834_s6 + $0x60] sm:$0xff]  ;;  %v168_v30 = vld [vmem:[%s834_s6 + $0xe8] sm:$0xff]  ;;  %177 = vmatpush.msra.mxu2 %v152_v23 }
   0xb   :  { %116 = vmatpush.msra.mxu1 %v83_v10  ;;  %196 = vmatpush.msra.mxu3 %v169_v24  ;;  %v150_v31 = vld [vmem:[%s834_s6 + $0x58] sm:$0xff]  ;;  %v167_v32 = vld [vmem:[%s834_s6 + $0xe0] sm:$0xff] }
   0xc   :  { %97 = vmatpush.msra.mxu0 %v66_v11 }
   0xd   :  { %117 = vmatpush.msra.mxu1 %v82_v12 }
   0xe   :  { %98 = vmatpush.msra.mxu0 %v65_v13 }
   0xf   :  { %118 = vmatpush.msra.mxu1 %v81_v14 }
  0x10   :  { %99 = vmatpush.msra.mxu0 %v64_v16 }
  0x11   :  { %119 = vmatpush.msra.mxu1 %v80_v19 }
  0x12   :  { %100 = vmatpush.msra.mxu0 %v63_v22 }
  0x13   :  { %120 = vmatpush.msra.mxu1 %v79_v26 }
  0x14   :  { %21 = vsyncpa [#allocation4], 0  ;;  %v61_v33 = vld [vmem:[%s832_s4 + $0x28] sm:$0xff]  ;;  %178 = vmatpush.msra.mxu2 %v151_v29  ;;  %197 = vmatpush.msra.mxu3 %v168_v30  ;;  %v149_v36 = vld [vmem:[%s834_s6 + $0x50] sm:$0xff]  ;;  %s400_s25 = smov [#allocation3]   ;;  %s345_s27 = sshll.u32 %s843_s15, 4  ;;  %s346_s27 = int_to_ptr.hbm [resolvable:$true] %s345_s27 }
  0x15   :  { %v77_v34 = vld [vmem:[%s832_s4 + $0xa8] sm:$0xff]  ;;  %101 = vmatpush.msra.mxu0 %v62_v25  ;;  %121 = vmatpush.msra.mxu1 %v78_v27  ;;  %v166_v37 = vld [vmem:[%s834_s6 + $0xd8] sm:$0xff]  ;;  %v60_v38 = vld [vmem:[%s832_s4 + $0x20] sm:$0xff]  ;;  %s343_s0 = sshll.u32 %s400_s25, 4  ;;  %s344_s0 = int_to_ptr.vmem [resolvable:$true] %s343_s0 }
  0x16   :  { %v55_v35 = vld [vmem:[#allocation2 + $0x8] sm:$0xff]  ;;  %v76_v39 = vld [vmem:[%s832_s4 + $0xa0] sm:$0xff]  ;;  %179 = vmatpush.msra.mxu2 %v150_v31  ;;  %198 = vmatpush.msra.mxu3 %v167_v32  ;;  %v59_v40 = vld [vmem:[%s832_s4 + $0x18] sm:$0xff] }
  0x17   :  { %136 = vst.msk [vmem:[#allocation2 + $0x8] sm:$0xff] %vm52_vm1, %v135_v28  ;;  %102 = vmatpush.msra.mxu0 %v61_v33  ;;  %122 = vmatpush.msra.mxu1 %v77_v34  ;;  %v75_v41 = vld [vmem:[%s832_s4 + $0x98] sm:$0xff]  ;;  %v58_v42 = vld [vmem:[%s832_s4 + $0x10] sm:$0xff]  ;;  %v57_v44 = vld [vmem:[%s832_s4 + $0x8] sm:$0xff] }
  0x18   :  { %180 = vmatpush.msra.mxu2 %v149_v36  ;;  %199 = vmatpush.msra.mxu3 %v166_v37  ;;  %v74_v43 = vld [vmem:[%s832_s4 + $0x90] sm:$0xff]  ;;  %v73_v45 = vld [vmem:[%s832_s4 + $0x88] sm:$0xff]  ;;  %v56_v46 = vld [vmem:[%s832_s4] sm:$0xff] }
  0x19   :  { %103 = vmatpush.msra.mxu0 %v60_v38  ;;  %123 = vmatpush.msra.mxu1 %v76_v39  ;;  %v72_v47 = vld [vmem:[%s832_s4 + $0x80] sm:$0xff]  ;;  %v148_v49 = vld [vmem:[%s834_s6 + $0x48] sm:$0xff]  ;;  %v165_v50 = vld [vmem:[%s834_s6 + $0xd0] sm:$0xff] }
  0x1a   :  { %v54_v48 = vld [vmem:[#allocation2] sm:$0xff]  ;;  %181 = vmatpush.msra.mxu2 %v148_v49  ;;  %200 = vmatpush.msra.mxu3 %v165_v50  ;;  %v164_v52 = vld [vmem:[%s834_s6 + $0xc8] sm:$0xff]  ;;  %v146_v53 = vld [vmem:[%s834_s6 + $0x38] sm:$0xff] }
  0x1b   :  { %104 = vmatpush.msra.mxu0 %v59_v40  ;;  %124 = vmatpush.msra.mxu1 %v75_v41  ;;  %v147_v51 = vld [vmem:[%s834_s6 + $0x40] sm:$0xff]  ;;  %v145_v55 = vld [vmem:[%s834_s6 + $0x30] sm:$0xff]  ;;  %v162_v56 = vld [vmem:[%s834_s6 + $0xb8] sm:$0xff] }
  0x1c   :  { %182 = vmatpush.msra.mxu2 %v147_v51  ;;  %201 = vmatpush.msra.mxu3 %v164_v52  ;;  %v163_v54 = vld [vmem:[%s834_s6 + $0xc0] sm:$0xff]  ;;  %v144_v57 = vld [vmem:[%s834_s6 + $0x28] sm:$0xff]  ;;  %v161_v58 = vld [vmem:[%s834_s6 + $0xb0] sm:$0xff] }
  0x1d   :  { %105 = vmatpush.msra.mxu0 %v58_v42  ;;  %125 = vmatpush.msra.mxu1 %v74_v43  ;;  %v143_v59 = vld [vmem:[%s834_s6 + $0x20] sm:$0xff]  ;;  %v160_v60 = vld [vmem:[%s834_s6 + $0xa8] sm:$0xff]  ;;  %v142_v61 = vld [vmem:[%s834_s6 + $0x18] sm:$0xff] }
  0x1e   :  { %183 = vmatpush.msra.mxu2 %v146_v53  ;;  %202 = vmatpush.msra.mxu3 %v163_v54  ;;  %v159_v62 = vld [vmem:[%s834_s6 + $0xa0] sm:$0xff]  ;;  %v141_v63 = vld [vmem:[%s834_s6 + $0x10] sm:$0xff]  ;;  %v158_v0 = vld [vmem:[%s834_s6 + $0x98] sm:$0xff] }
  0x1f   :  { %106 = vmatpush.msra.mxu0 %v57_v44  ;;  %126 = vmatpush.msra.mxu1 %v73_v45  ;;  %v140_v1 = vld [vmem:[%s834_s6 + $0x8] sm:$0xff]  ;;  %v157_v2 = vld [vmem:[%s834_s6 + $0x90] sm:$0xff]  ;;  %v139_v3 = vld [vmem:[%s834_s6] sm:$0xff] }
  0x20   :  { %184 = vmatpush.msra.mxu2 %v145_v55  ;;  %203 = vmatpush.msra.mxu3 %v162_v56  ;;  %v156_v4 = vld [vmem:[%s834_s6 + $0x88] sm:$0xff]  ;;  %v155_v5 = vld [vmem:[%s834_s6 + $0x80] sm:$0xff]  ;;  %v237_v8 = vld [vmem:[%s836_s8 + $0x78] sm:$0xff] }
  0x21   :  { %107 = vmatpush.msra.mxu0 %v56_v46  ;;  %127 = vmatpush.msra.mxu1 %v72_v47  ;;  %v138_v6 = vld [vmem:[#allocation2 + $0x8] sm:$0xff]  ;;  %v218_v7 = vld [vmem:[%s831_s3] sm:$0xff]  ;;  %v236_v9 = vld [vmem:[%s836_s8 + $0x70] sm:$0xff] }
  0x22   :  { %108 = vmatmul.f32.vlgmr.msra.gmra.mxu0 %v54_v48  ;;  %128 = vmatmul.f32.vlgmr.msra.gmra.mxu1 %v55_v35  ;;  %219 = vst.msk [vmem:[#allocation2 + $0x8] sm:$0xff] %vm52_vm1, %v218_v7  ;;  %v253_v10 = vld [vmem:[%s836_s8 + $0xf8] sm:$0xff]  ;;  %v252_v11 = vld [vmem:[%s836_s8 + $0xf0] sm:$0xff]  ;;  %v235_v12 = vld [vmem:[%s836_s8 + $0x68] sm:$0xff] }
  0x23   :  { %185 = vmatpush.msra.mxu2 %v144_v57  ;;  %204 = vmatpush.msra.mxu3 %v161_v58  ;;  %v251_v13 = vld [vmem:[%s836_s8 + $0xe8] sm:$0xff]  ;;  %v234_v14 = vld [vmem:[%s836_s8 + $0x60] sm:$0xff]  ;;  %v233_v16 = vld [vmem:[%s836_s8 + $0x58] sm:$0xff] }
  0x24   :  { %258 = vmatpush.msrb.mxu0 %v237_v8  ;;  %278 = vmatpush.msrb.mxu1 %v253_v10  ;;  %v250_v15 = vld [vmem:[%s836_s8 + $0xe0] sm:$0xff]  ;;  %v249_v18 = vld [vmem:[%s836_s8 + $0xd8] sm:$0xff]  ;;  %v232_v19 = vld [vmem:[%s836_s8 + $0x50] sm:$0xff] }
  0x25   :  { %186 = vmatpush.msra.mxu2 %v143_v59  ;;  %205 = vmatpush.msra.mxu3 %v160_v60  ;;  %v363_v17 = vld [vmem:[%s833_s5] ss:$0 sm:$0xff]  ;;  %v231_v26 = vld [vmem:[%s836_s8 + $0x48] sm:$0xff]  ;;  %v248_v27 = vld [vmem:[%s836_s8 + $0xd0] sm:$0xff] }
  0x26   :  { %259 = vmatpush.msrb.mxu0 %v236_v9  ;;  %279 = vmatpush.msrb.mxu1 %v252_v11  ;;  %v230_v28 = vld [vmem:[%s836_s8 + $0x40] sm:$0xff]  ;;  %v247_v29 = vld [vmem:[%s836_s8 + $0xc8] sm:$0xff]  ;;  %v229_v30 = vld [vmem:[%s836_s8 + $0x38] sm:$0xff] }
  0x27   :  { %187 = vmatpush.msra.mxu2 %v142_v61  ;;  %206 = vmatpush.msra.mxu3 %v159_v62  ;;  %v246_v31 = vld [vmem:[%s836_s8 + $0xc0] sm:$0xff]  ;;  %v228_v32 = vld [vmem:[%s836_s8 + $0x30] sm:$0xff]  ;;  %v245_v33 = vld [vmem:[%s836_s8 + $0xb8] sm:$0xff] }
  0x28   :  { %260 = vmatpush.msrb.mxu0 %v235_v12  ;;  %280 = vmatpush.msrb.mxu1 %v251_v13  ;;  %v227_v34 = vld [vmem:[%s836_s8 + $0x28] sm:$0xff]  ;;  %v244_v35 = vld [vmem:[%s836_s8 + $0xb0] sm:$0xff]  ;;  %v226_v36 = vld [vmem:[%s836_s8 + $0x20] sm:$0xff] }
  0x29   :  { %188 = vmatpush.msra.mxu2 %v141_v63  ;;  %207 = vmatpush.msra.mxu3 %v158_v0  ;;  %v243_v37 = vld [vmem:[%s836_s8 + $0xa8] sm:$0xff]  ;;  %v225_v38 = vld [vmem:[%s836_s8 + $0x18] sm:$0xff]  ;;  %v242_v39 = vld [vmem:[%s836_s8 + $0xa0] sm:$0xff] }
  0x2a   :  { %261 = vmatpush.msrb.mxu0 %v234_v14  ;;  %281 = vmatpush.msrb.mxu1 %v250_v15  ;;  %v224_v40 = vld [vmem:[%s836_s8 + $0x10] sm:$0xff]  ;;  %v241_v41 = vld [vmem:[%s836_s8 + $0x98] sm:$0xff]  ;;  %v223_v42 = vld [vmem:[%s836_s8 + $0x8] sm:$0xff] }
  0x2b   :  { %189 = vmatpush.msra.mxu2 %v140_v1  ;;  %208 = vmatpush.msra.mxu3 %v157_v2  ;;  %v240_v43 = vld [vmem:[%s836_s8 + $0x90] sm:$0xff]  ;;  %v222_v44 = vld [vmem:[%s836_s8] sm:$0xff]  ;;  %v239_v45 = vld [vmem:[%s836_s8 + $0x88] sm:$0xff] }
  0x2c   :  { %262 = vmatpush.msrb.mxu0 %v233_v16  ;;  %282 = vmatpush.msrb.mxu1 %v249_v18  ;;  %v238_v46 = vld [vmem:[%s836_s8 + $0x80] sm:$0xff]  ;;  %v221_v47 = vld [vmem:[#allocation2 + $0x8] sm:$0xff]  ;;  %v303_v55 = vld [vmem:[%s838_s10 + $0x18] sm:$0xff] }
  0x2d   :  { %190 = vmatpush.msra.mxu2 %v139_v3  ;;  %209 = vmatpush.msra.mxu3 %v156_v4  ;;  %v364_v48 = vld [vmem:[%s835_s7] ss:$0 sm:$0xff]  ;;  %v302_v56 = vld [vmem:[%s838_s10 + $0x10] sm:$0xff]  ;;  %v301_v57 = vld [vmem:[%s838_s10 + $0x8] sm:$0xff] }
  0x2e   :  { %263 = vmatpush.msrb.mxu0 %v232_v19  ;;  %283 = vmatpush.msrb.mxu1 %v248_v27  ;;  %v300_v58 = vld [vmem:[%s838_s10] sm:$0xff] }
  0x2f   :  { %210 = vmatpush.msra.mxu3 %v155_v5  ;;  %323 = vmatpush.msrb.mxu2 %v303_v55  ;;  %v365_v59 = vld [vmem:[%s837_s9] ss:$0 sm:$0xff] }
  0x30   :  { %211 = vmatmul.f32.vlgmr.msra.gmra.mxu3 %v138_v6  ;;  %264 = vmatpush.msrb.mxu0 %v231_v26  ;;  %v366_v1 = vld [vmem:[%s839_s11] ss:$0 sm:$0xff] }
  0x31   :  { %284 = vmatpush.msrb.mxu1 %v247_v29  ;;  %324 = vmatpush.msrb.mxu2 %v302_v56 }
  0x32   :  { %265 = vmatpush.msrb.mxu0 %v230_v28 }
  0x33   :  { %285 = vmatpush.msrb.mxu1 %v246_v31  ;;  %325 = vmatpush.msrb.mxu2 %v301_v57 }
  0x34   :  { %266 = vmatpush.msrb.mxu0 %v229_v30 }
  0x35   :  { %286 = vmatpush.msrb.mxu1 %v245_v33  ;;  %326 = vmatpush.msrb.mxu2 %v300_v58 }
  0x36   :  { %267 = vmatpush.msrb.mxu0 %v228_v32 }
  0x37   :  { %287 = vmatpush.msrb.mxu1 %v244_v35 }
  0x38   :  { %268 = vmatpush.msrb.mxu0 %v227_v34 }
  0x39   :  { %288 = vmatpush.msrb.mxu1 %v243_v37 }
  0x3a   :  { %269 = vmatpush.msrb.mxu0 %v226_v36 }
  0x3b   :  { %289 = vmatpush.msrb.mxu1 %v242_v39 }
  0x3c   :  { %270 = vmatpush.msrb.mxu0 %v225_v38 }
  0x3d   :  { %290 = vmatpush.msrb.mxu1 %v241_v41 }
  0x3e   :  { %271 = vmatpush.msrb.mxu0 %v224_v40 }
  0x3f   :  { %291 = vmatpush.msrb.mxu1 %v240_v43 }
  0x40   :  { %272 = vmatpush.msrb.mxu0 %v223_v42 }
  0x41   :  { %292 = vmatpush.msrb.mxu1 %v239_v45 }
  0x42   :  { %273 = vmatpush.msrb.mxu0 %v222_v44 }
  0x43   :  { %293 = vmatpush.msrb.mxu1 %v238_v46 }
  0x44   :  { %294 = vmatmul.f32.vlgmr.msrb.gmra.mxu1 %v221_v47 }
  0x9f   :  { %v109_v20 = vpop.f32.mrf.mxu0  ;;  %v129_v21 = vpop.f32.mrf.mxu1 }
  0xa0   :  { %v110_v22 = vadd.f32 %v363_v17, %v109_v20 }
  0xa2   :  { %v130_v23 = vadd.f32 %v129_v21, %v110_v22 }
  0xa4   :  { %367 = vtanh.f32 %v130_v23 }
  0xaa   :  { %v368_v24 = vpop.eup %367 }
  0xab   :  { %133 = vst.msk [vmem:[%s840_s12] sm:$0xff] %vm52_vm1, %v368_v24 }
  0xac   :  { %134 = vst.msk [vmem:[#allocation2] sm:$0xff] %vm52_vm1, %v368_v24 }
  0xb3   :  { %v137_v25 = vld [vmem:[#allocation2] sm:$0xff]  ;;  %v212_v50 = vpop.f32.mrf.mxu3 }
  0xb4   :  { %191 = vmatmul.f32.vlgmr.msra.gmra.mxu2 %v137_v25 }
  0xc1   :  { %v295_v61 = vpop.f32.mrf.mxu1 }
 0x137   :  { %v192_v49 = vpop.f32.mrf.mxu2 }
 0x138   :  { %v193_v51 = vadd.f32 %v364_v48, %v192_v49 }
 0x13a   :  { %v213_v52 = vadd.f32 %v212_v50, %v193_v51 }
 0x13c   :  { %369 = vtanh.f32 %v213_v52 }
 0x142   :  { %v370_v53 = vpop.eup %369 }
 0x143   :  { %216 = vst.msk [vmem:[%s841_s13] sm:$0xff] %vm52_vm1, %v370_v53 }
 0x144   :  { %217 = vst.msk [vmem:[#allocation2] sm:$0xff] %vm52_vm1, %v370_v53 }
 0x14b   :  { %v220_v54 = vld [vmem:[#allocation2] sm:$0xff] }
 0x14c   :  { %274 = vmatmul.f32.vlgmr.msrb.gmra.mxu0 %v220_v54 }
 0x1c9   :  { %v275_v60 = vpop.f32.mrf.mxu0 }
 0x1ca   :  { %v276_v62 = vadd.f32 %v365_v59, %v275_v60 }
 0x1cc   :  { %v296_v63 = vadd.f32 %v295_v61, %v276_v62 }
 0x1ce   :  { %371 = vtanh.f32 %v296_v63 }
 0x1d4   :  { %v372_v0 = vpop.eup %371 }
 0x1d5   :  { %299 = vst.msk [vmem:[%s842_s14] sm:$0xff] %vm52_vm1, %v372_v0  ;;  %360 = vmatmul.msk.f32.vlgmr.msrb.gmra.mxu2 %vm52_vm1, %v372_v0 }
 0x258   :  { %v328_v2 = vpop.f32.mrf.mxu2 }
 0x259   :  { %v329_v3 = vadd.f32 %v366_v1, %v328_v2 }
 0x25b   :  { %331 = vst.msk [vmem:[#allocation3] sm:$0xff] %vm49_vm0, %v329_v3 }
 0x25c   :  { %348 = dma.vmem_to_hbm [thread:$0]  %s344_s0, 128, %s346_s27, [#allocation4]  }
 0x25d   :  { %397 = dma.done.wait [#allocation4], 128  }
 0x25e   :  { %398 = vsyncadd [#allocation4], 4294967168 }
 0x25f   :  { %359 = vsyncpa [#allocation4], 1 }

</bundles_post_ra>
